<compile_context>
chip_gen: v7x
topology: tpu7x:2x2x1
jax: 0.10.0
libtpu: 0.0.40
codegen_flags: <defaults>
</compile_context>

<pallas_src>
import functools
import math

import jax
import jax.numpy as jnp
from jax import lax
from jax.experimental import pallas as pl
from jax.experimental.pallas import tpu as pltpu


def _round_up(n, m):
    return ((n + m - 1) // m) * m


# ----------------------------------------------------------------------------
# Kernel: one row-tile of the gated merge
# ----------------------------------------------------------------------------
def gmu_kernel(x1_ref, x2_ref, w1_ref, w2_ref, b_ref, o_ref, *, d):
    x1 = x1_ref[...]                                    # (TM, D)  bf16
    # Fused projection [gate | transform]:
    #   proj = x1 @ W1 + x2 @ W2 + b               -> (TM, 2D) f32 accumulator
    proj = jnp.dot(x1, w1_ref[...], preferred_element_type=jnp.float32)
    proj = proj + jnp.dot(x2_ref[...], w2_ref[...],
                          preferred_element_type=jnp.float32)
    proj = proj + b_ref[...]
    # Gate columns of W/b were pre-scaled by 0.5 at init, so
    #   sigmoid(z) == 0.5 * (tanh(z/2) + 1) == 0.5 * (tanh(proj_gate) + 1)
    # and a single tanh over the full (TM, 2D) tile covers both halves (EUP).
    t = jnp.tanh(proj)
    gate = 0.5 * (t[:, :d] + 1.0)        # lane-aligned slice (d % 128 == 0)
    transform = t[:, d:]
    x1f = x1.astype(jnp.float32)
    # gate*tr + (1-gate)*x1  ==  x1 + gate*(tr - x1)   (one fewer VALU op)
    o_ref[...] = (x1f + gate * (transform - x1f)).astype(o_ref.dtype)


# ----------------------------------------------------------------------------
# pallas_call builder (optionally single-buffering the resident weights)
# ----------------------------------------------------------------------------
def _build_call(n, d, block_rows, out_dtype, *, single_buffer_weights):
    if single_buffer_weights:
        # Constants are fetched once (index_map -> (0,0)); no point
        # double-buffering them. Matters for VMEM headroom at large D on v7x.
        const_kwargs = dict(pipeline_mode=pl.Buffered(1))
    else:
        const_kwargs = {}
    grid = (pl.cdiv(n, block_rows),)
    return pl.pallas_call(
        functools.partial(gmu_kernel, d=d),
        out_shape=jax.ShapeDtypeStruct((n, d), out_dtype),
        grid_spec=pltpu.PrefetchScalarGridSpec(
            num_scalar_prefetch=0,
            grid=grid,
            in_specs=[
                pl.BlockSpec((block_rows, d), lambda i: (i, 0)),              # x1 tile
                pl.BlockSpec((block_rows, d), lambda i: (i, 0)),              # x2 tile
                pl.BlockSpec((d, 2 * d), lambda i: (0, 0), **const_kwargs),   # W1 (resident)
                pl.BlockSpec((d, 2 * d), lambda i: (0, 0), **const_kwargs),   # W2 (resident)
                pl.BlockSpec((1, 2 * d), lambda i: (0, 0), **const_kwargs),   # bias (resident)
            ],
            out_specs=pl.BlockSpec((block_rows, d), lambda i: (i, 0)),
        ),
        compiler_params=pltpu.CompilerParams(
            dimension_semantics=("parallel",),        # megacore split on v7x
        ),
    )


# ----------------------------------------------------------------------------
# Wrapper: arbitrary leading dims, tiled over rows, no pad/slice HBM passes
# ----------------------------------------------------------------------------
def gated_merge_unit(x1, x2, params, *, block_rows=None):
    orig_shape = x1.shape
    d = orig_shape[-1]
    if d % 128 != 0:
        raise ValueError("feature dim must be a multiple of 128 for "
                         "lane-aligned gate/transform slices and stores")
    n = 1
    for s in orig_shape[:-1]:
        n *= s

    # Cast once to bf16 (no-op when the caller already streams bf16).
    x1f = x1.reshape(n, d)
    x2f = x2.reshape(n, d)
    if x1f.dtype != jnp.bfloat16:
        x1f = x1f.astype(jnp.bfloat16)
    if x2f.dtype != jnp.bfloat16:
        x2f = x2f.astype(jnp.bfloat16)

    if block_rows is None:
        block_rows = min(512, _round_up(n, 16))   # big tiles; bf16 sublane = 16
    block_rows = max(16, _round_up(block_rows, 16))

    w1, w2, b = params['w1'], params['w2'], params['b']
    args = (x1f, x2f, w1, w2, b)

    try:
        out = _build_call(n, d, block_rows, jnp.bfloat16,
                          single_buffer_weights=True)(*args)
    except Exception:
        # JAX without BlockSpec(pipeline_mode=...): default double-buffering.
        out = _build_call(n, d, block_rows, jnp.bfloat16,
                          single_buffer_weights=False)(*args)

    return out.reshape(orig_shape)


# ----------------------------------------------------------------------------
# Parameter init (PyTorch nn.Linear uniform bounds), pre-split / pre-fused
# ----------------------------------------------------------------------------
def init_params(key, input_dim):
    D = input_dim
    bound = 1.0 / math.sqrt(2 * D)
    kg_w, kg_b, kt_w, kt_b = jax.random.split(key, 4)

    wg = jax.random.uniform(kg_w, (D, 2 * D), jnp.float32, -bound, bound)  # fc_gate.weight
    bg = jax.random.uniform(kg_b, (D,), jnp.float32, -bound, bound)        # fc_gate.bias
    wt = jax.random.uniform(kt_w, (D, 2 * D), jnp.float32, -bound, bound)  # fc_transform.weight
    bt = jax.random.uniform(kt_b, (D,), jnp.float32, -bound, bound)        # fc_transform.bias

    # Kernel layout: split each weight into its concat halves, fuse
    # gate+transform along the output axis -> (D_in_half, 2*D_out), bf16.
    # Gate columns / bias pre-scaled by 0.5 so the kernel's single tanh pass
    # yields sigmoid on the gate half.
    w1 = jnp.concatenate([0.5 * wg[:, :D].T, wt[:, :D].T], axis=1).astype(jnp.bfloat16)
    w2 = jnp.concatenate([0.5 * wg[:, D:].T, wt[:, D:].T], axis=1).astype(jnp.bfloat16)
    b = jnp.concatenate([0.5 * bg, bt]).reshape(1, 2 * D)   # f32, added to f32 acc

    return {'w1': w1, 'w2': w2, 'b': b,
            'wg': wg, 'bg': bg, 'wt': wt, 'bt': bt}


# ----------------------------------------------------------------------------
# Pure-JAX reference (mirrors the PyTorch module exactly, f32 HIGHEST)
# ----------------------------------------------------------------------------
def reference_forward(x1, x2, params):
    x1 = x1.astype(jnp.float32)
    x2 = x2.astype(jnp.float32)
    x = jnp.concatenate([x1, x2], axis=-1)
    gate = jax.nn.sigmoid(
        jnp.dot(x, params['wg'].T, precision=lax.Precision.HIGHEST) + params['bg'])
    tr = jnp.tanh(
        jnp.dot(x, params['wt'].T, precision=lax.Precision.HIGHEST) + params['bt'])
    return gate * tr + (1.0 - gate) * x1


# ----------------------------------------------------------------------------
if __name__ == "__main__":
    # batch=2, seq=8, feature dim=128 -> 16 rows: one 16-row bf16 tile,
    # no padding, lane-aligned gate/transform slices and output stores.
    B, T, D = 2, 8, 128

    key = jax.random.PRNGKey(0)
    k1, k2, kp = jax.random.split(key, 3)
    # Stream bf16 activations (the kernel's native storage dtype).
    x1 = jax.random.normal(k1, (B, T, D), jnp.float32).astype(jnp.bfloat16)
    x2 = jax.random.normal(k2, (B, T, D), jnp.float32).astype(jnp.bfloat16)
    params = init_params(kp, D)

    out = gated_merge_unit(x1, x2, params)
    out = jax.block_until_ready(out)
    assert out.shape == (B, T, D), out.shape
    assert out.dtype == jnp.bfloat16, out.dtype

    ref = reference_forward(x1, x2, params)
    max_diff = float(jnp.max(jnp.abs(out.astype(jnp.float32) - ref)))
    # bf16 weights/activations/output vs an f32 HIGHEST-precision reference.
    if max_diff > 5e-2:
        raise AssertionError(f"mismatch vs reference, max diff {max_diff:e}")

    print("KERNEL_OK")
</pallas_src>

<mosaic_0001>
module attributes {stable_mosaic.version = 11 : i64} {
  func.func @gmu_kernel(%arg0: i32, %arg1: memref<16x128xbf16, #tpu.memory_space<vmem>>, %arg2: memref<16x128xbf16, #tpu.memory_space<vmem>>, %arg3: memref<128x256xbf16, #tpu.memory_space<vmem>>, %arg4: memref<128x256xbf16, #tpu.memory_space<vmem>>, %arg5: memref<1x256xf32, #tpu.memory_space<vmem>>, %arg6: memref<16x128xbf16, #tpu.memory_space<vmem>>) attributes {dimension_semantics = [#tpu.dimension_semantics<parallel>], iteration_bounds = array<i64: 1>, scalar_prefetch = 0 : i64, scratch_operands = 0 : i64, tpu.core_type = #tpu.core_type<tc>, window_params = [{transform_indices = @transform_0, window_bounds = array<i64: 16, 128>}, {transform_indices = @transform_1, window_bounds = array<i64: 16, 128>}, {pipeline_mode = #tpu.pipeline_mode<synchronous>, transform_indices = @transform_2, window_bounds = array<i64: 128, 256>}, {pipeline_mode = #tpu.pipeline_mode<synchronous>, transform_indices = @transform_3, window_bounds = array<i64: 128, 256>}, {pipeline_mode = #tpu.pipeline_mode<synchronous>, transform_indices = @transform_4, window_bounds = array<i64: 1, 256>}, {transform_indices = @transform_5, window_bounds = array<i64: 16, 128>}]} {
    %c0 = arith.constant 0 : index
    %c0_0 = arith.constant 0 : index
    %0 = vector.load %arg1[%c0, %c0_0] : memref<16x128xbf16, #tpu.memory_space<vmem>>, vector<16x128xbf16>
    %c0_1 = arith.constant 0 : index
    %c0_2 = arith.constant 0 : index
    %1 = vector.load %arg3[%c0_1, %c0_2] : memref<128x256xbf16, #tpu.memory_space<vmem>>, vector<128x256xbf16>
    %cst = arith.constant dense<0.000000e+00> : vector<16x256xf32>
    %2 = tpu.matmul %0, %1, %cst {dimension_numbers = #tpu.dot_dimension_numbers<[1], [0], [0], [1], [0, 0, 1, 1], [], []>} : vector<16x128xbf16>, vector<128x256xbf16>, vector<16x256xf32> -> vector<16x256xf32>
    %c0_3 = arith.constant 0 : index
    %c0_4 = arith.constant 0 : index
    %3 = vector.load %arg2[%c0_3, %c0_4] : memref<16x128xbf16, #tpu.memory_space<vmem>>, vector<16x128xbf16>
    %c0_5 = arith.constant 0 : index
    %c0_6 = arith.constant 0 : index
    %4 = vector.load %arg4[%c0_5, %c0_6] : memref<128x256xbf16, #tpu.memory_space<vmem>>, vector<128x256xbf16>
    %cst_7 = arith.constant dense<0.000000e+00> : vector<16x256xf32>
    %5 = tpu.matmul %3, %4, %cst_7 {dimension_numbers = #tpu.dot_dimension_numbers<[1], [0], [0], [1], [0, 0, 1, 1], [], []>} : vector<16x128xbf16>, vector<128x256xbf16>, vector<16x256xf32> -> vector<16x256xf32>
    %6 = arith.addf %2, %5 : vector<16x256xf32>
    %c0_8 = arith.constant 0 : index
    %c0_9 = arith.constant 0 : index
    %7 = vector.load %arg5[%c0_8, %c0_9] : memref<1x256xf32, #tpu.memory_space<vmem>>, vector<1x256xf32>
    %8 = vector.broadcast %7 : vector<1x256xf32> to vector<16x256xf32>
    %9 = arith.addf %6, %8 : vector<16x256xf32>
    %10 = math.tanh %9 : vector<16x256xf32>
    %11 = vector.extract_strided_slice %10 {offsets = [0, 0], sizes = [16, 128], strides = [1, 1]} : vector<16x256xf32> to vector<16x128xf32>
    %cst_10 = arith.constant 1.000000e+00 : f32
    %12 = vector.broadcast %cst_10 : f32 to vector<16x128xf32>
    %13 = arith.addf %11, %12 : vector<16x128xf32>
    %cst_11 = arith.constant 5.000000e-01 : f32
    %14 = vector.broadcast %cst_11 : f32 to vector<16x128xf32>
    %15 = arith.mulf %14, %13 : vector<16x128xf32>
    %16 = vector.extract_strided_slice %10 {offsets = [0, 128], sizes = [16, 128], strides = [1, 1]} : vector<16x256xf32> to vector<16x128xf32>
    %17 = arith.extf %0 : vector<16x128xbf16> to vector<16x128xf32>
    %18 = arith.subf %16, %17 : vector<16x128xf32>
    %19 = arith.mulf %15, %18 : vector<16x128xf32>
    %20 = arith.addf %17, %19 : vector<16x128xf32>
    %21 = arith.truncf %20 : vector<16x128xf32> to vector<16x128xbf16>
    %c0_12 = arith.constant 0 : index
    %c0_13 = arith.constant 0 : index
    %22 = vector.load %arg6[%c0_12, %c0_13] : memref<16x128xbf16, #tpu.memory_space<vmem>>, vector<16x128xbf16>
    tpu.vector_store %arg6[%c0_12, %c0_13], %21 {strides = array<i32>} : memref<16x128xbf16, #tpu.memory_space<vmem>>, vector<16x128xbf16>,
    return
  }
  func.func @transform_0(%arg0: i32) -> (i32, i32) {
    %c0_i32 = arith.constant 0 : i32
    %c0_i32_0 = arith.constant 0 : i32
    return %arg0, %c0_i32 : i32, i32
  }
  func.func @transform_1(%arg0: i32) -> (i32, i32) {
    %c0_i32 = arith.constant 0 : i32
    %c0_i32_0 = arith.constant 0 : i32
    return %arg0, %c0_i32 : i32, i32
  }
  func.func @transform_2(%arg0: i32) -> (i32, i32) {
    %c0_i32 = arith.constant 0 : i32
    %c0_i32_0 = arith.constant 0 : i32
    %c0_i32_1 = arith.constant 0 : i32
    return %c0_i32, %c0_i32_0 : i32, i32
  }
  func.func @transform_3(%arg0: i32) -> (i32, i32) {
    %c0_i32 = arith.constant 0 : i32
    %c0_i32_0 = arith.constant 0 : i32
    %c0_i32_1 = arith.constant 0 : i32
    return %c0_i32, %c0_i32_0 : i32, i32
  }
  func.func @transform_4(%arg0: i32) -> (i32, i32) {
    %c0_i32 = arith.constant 0 : i32
    %c0_i32_0 = arith.constant 0 : i32
    %c0_i32_1 = arith.constant 0 : i32
    return %c0_i32, %c0_i32_0 : i32, i32
  }
  func.func @transform_5(%arg0: i32) -> (i32, i32) {
    %c0_i32 = arith.constant 0 : i32
    %c0_i32_0 = arith.constant 0 : i32
    return %arg0, %c0_i32 : i32, i32
  }
}

module attributes {stable_mosaic.version = 11 : i64} {
  func.func @gmu_kernel(%arg0: i32, %arg1: memref<16x128xbf16, #tpu.memory_space<vmem>>, %arg2: memref<16x128xbf16, #tpu.memory_space<vmem>>, %arg3: memref<128x256xbf16, #tpu.memory_space<vmem>>, %arg4: memref<128x256xbf16, #tpu.memory_space<vmem>>, %arg5: memref<1x256xf32, #tpu.memory_space<vmem>>, %arg6: memref<16x128xbf16, #tpu.memory_space<vmem>>) attributes {dimension_semantics = [#tpu.dimension_semantics<parallel>], iteration_bounds = array<i64: 1>, scalar_prefetch = 0 : i64, scratch_operands = 0 : i64, tpu.core_type = #tpu.core_type<tc>, window_params = [{transform_indices = @transform_0, window_bounds = array<i64: 16, 128>}, {transform_indices = @transform_1, window_bounds = array<i64: 16, 128>}, {pipeline_mode = #tpu.pipeline_mode<synchronous>, transform_indices = @transform_2, window_bounds = array<i64: 128, 256>}, {pipeline_mode = #tpu.pipeline_mode<synchronous>, transform_indices = @transform_3, window_bounds = array<i64: 128, 256>}, {pipeline_mode = #tpu.pipeline_mode<synchronous>, transform_indices = @transform_4, window_bounds = array<i64: 1, 256>}, {transform_indices = @transform_5, window_bounds = array<i64: 16, 128>}]} {
    %c0 = arith.constant 0 : index
    %c0_0 = arith.constant 0 : index
    %0 = vector.load %arg1[%c0, %c0_0] : memref<16x128xbf16, #tpu.memory_space<vmem>>, vector<16x128xbf16>
    %c0_1 = arith.constant 0 : index
    %c0_2 = arith.constant 0 : index
    %1 = vector.load %arg3[%c0_1, %c0_2] : memref<128x256xbf16, #tpu.memory_space<vmem>>, vector<128x256xbf16>
    %cst = arith.constant dense<0.000000e+00> : vector<16x256xf32>
    %2 = tpu.matmul %0, %1, %cst {dimension_numbers = #tpu.dot_dimension_numbers<[1], [0], [0], [1], [0, 0, 1, 1], [], []>} : vector<16x128xbf16>, vector<128x256xbf16>, vector<16x256xf32> -> vector<16x256xf32>
    %c0_3 = arith.constant 0 : index
    %c0_4 = arith.constant 0 : index
    %3 = vector.load %arg2[%c0_3, %c0_4] : memref<16x128xbf16, #tpu.memory_space<vmem>>, vector<16x128xbf16>
    %c0_5 = arith.constant 0 : index
    %c0_6 = arith.constant 0 : index
    %4 = vector.load %arg4[%c0_5, %c0_6] : memref<128x256xbf16, #tpu.memory_space<vmem>>, vector<128x256xbf16>
    %cst_7 = arith.constant dense<0.000000e+00> : vector<16x256xf32>
    %5 = tpu.matmul %3, %4, %cst_7 {dimension_numbers = #tpu.dot_dimension_numbers<[1], [0], [0], [1], [0, 0, 1, 1], [], []>} : vector<16x128xbf16>, vector<128x256xbf16>, vector<16x256xf32> -> vector<16x256xf32>
    %6 = arith.addf %2, %5 : vector<16x256xf32>
    %c0_8 = arith.constant 0 : index
    %c0_9 = arith.constant 0 : index
    %7 = vector.load %arg5[%c0_8, %c0_9] : memref<1x256xf32, #tpu.memory_space<vmem>>, vector<1x256xf32>
    %8 = vector.broadcast %7 : vector<1x256xf32> to vector<16x256xf32>
    %9 = arith.addf %6, %8 : vector<16x256xf32>
    %10 = math.tanh %9 : vector<16x256xf32>
    %11 = vector.extract_strided_slice %10 {offsets = [0, 0], sizes = [16, 128], strides = [1, 1]} : vector<16x256xf32> to vector<16x128xf32>
    %cst_10 = arith.constant 1.000000e+00 : f32
    %12 = vector.broadcast %cst_10 : f32 to vector<16x128xf32>
    %13 = arith.addf %11, %12 : vector<16x128xf32>
    %cst_11 = arith.constant 5.000000e-01 : f32
    %14 = vector.broadcast %cst_11 : f32 to vector<16x128xf32>
    %15 = arith.mulf %14, %13 : vector<16x128xf32>
    %16 = vector.extract_strided_slice %10 {offsets = [0, 128], sizes = [16, 128], strides = [1, 1]} : vector<16x256xf32> to vector<16x128xf32>
    %17 = arith.extf %0 : vector<16x128xbf16> to vector<16x128xf32>
    %18 = arith.subf %16, %17 : vector<16x128xf32>
    %19 = arith.mulf %15, %18 : vector<16x128xf32>
    %20 = arith.addf %17, %19 : vector<16x128xf32>
    %21 = arith.truncf %20 : vector<16x128xf32> to vector<16x128xbf16>
    %c0_12 = arith.constant 0 : index
    %c0_13 = arith.constant 0 : index
    %22 = vector.load %arg6[%c0_12, %c0_13] : memref<16x128xbf16, #tpu.memory_space<vmem>>, vector<16x128xbf16>
    tpu.vector_store %arg6[%c0_12, %c0_13], %21 {strides = array<i32>} : memref<16x128xbf16, #tpu.memory_space<vmem>>, vector<16x128xbf16>,
    return
  }
  func.func @transform_0(%arg0: i32) -> (i32, i32) {
    %c0_i32 = arith.constant 0 : i32
    %c0_i32_0 = arith.constant 0 : i32
    return %arg0, %c0_i32 : i32, i32
  }
  func.func @transform_1(%arg0: i32) -> (i32, i32) {
    %c0_i32 = arith.constant 0 : i32
    %c0_i32_0 = arith.constant 0 : i32
    return %arg0, %c0_i32 : i32, i32
  }
  func.func @transform_2(%arg0: i32) -> (i32, i32) {
    %c0_i32 = arith.constant 0 : i32
    %c0_i32_0 = arith.constant 0 : i32
    %c0_i32_1 = arith.constant 0 : i32
    return %c0_i32, %c0_i32_0 : i32, i32
  }
  func.func @transform_3(%arg0: i32) -> (i32, i32) {
    %c0_i32 = arith.constant 0 : i32
    %c0_i32_0 = arith.constant 0 : i32
    %c0_i32_1 = arith.constant 0 : i32
    return %c0_i32, %c0_i32_0 : i32, i32
  }
  func.func @transform_4(%arg0: i32) -> (i32, i32) {
    %c0_i32 = arith.constant 0 : i32
    %c0_i32_0 = arith.constant 0 : i32
    %c0_i32_1 = arith.constant 0 : i32
    return %c0_i32, %c0_i32_0 : i32, i32
  }
  func.func @transform_5(%arg0: i32) -> (i32, i32) {
    %c0_i32 = arith.constant 0 : i32
    %c0_i32_0 = arith.constant 0 : i32
    return %arg0, %c0_i32 : i32, i32
  }
}

</mosaic_0001>

<bundles_post_ra>
// kernel: tpu_custom_call.1
= control target key start
LH: loop header
LB: loop body
LE: loop exit
PB: predicated region body
PF: predicated region fallthrough
CT: control target
= control target key end

     0   :  { %10 = vsyncpa [#allocation3], 0  ;;  %s785_s0 = inlined_call_operand.hbm [shape: bf16[16,128], index: 0, kind: input, shape index: {}]   ;;  %s786_s1 = inlined_call_operand.hbm [shape: bf16[16,128], index: 1, kind: input, shape index: {}]   ;;  %s787_s2 = inlined_call_operand.hbm [shape: bf16[128,256], index: 2, kind: input, shape index: {}]   ;;  %s788_s3 = inlined_call_operand.hbm [shape: bf16[128,256], index: 3, kind: input, shape index: {}]   ;;  %s789_s4 = inlined_call_operand.vmem [shape: f32[1,256], index: 4, kind: input, shape index: {}]   ;;  %s790_s5 = inlined_call_operand.hbm [shape: bf16[16,128], index: 5, kind: output, shape index: {}]  }
   0x1   :  { %11 = vsyncpa [#allocation6], 0 }
   0x2   :  { %12 = vsyncpa [#allocation9], 0 }
   0x3   :  { %13 = vsyncpa [#allocation4], 0  ;;  %s666_s18 = smov [#allocation5]   ;;  %s667_s20 = smov [#allocation2]  }
   0x4   :  { %s31_s19 = sshll.u32 %s666_s18, 4  ;;  %s19_s21 = sshll.u32 %s667_s20, 4  ;;  %s32_s19 = int_to_ptr.vmem [resolvable:$true] %s31_s19  ;;  %s706_s21 = int_to_ptr.vmem [resolvable:$true] %s19_s21 }
   0x5   :  { %s548_s24 = scalar_lea.hbm %s786_s1, 128 }
   0x6   :  { %p549_p0 = scmp.ne.s32.totalorder %s786_s1, %s548_s24  ;;  %p552_p1 = scmp.lt.u32.totalorder %s548_s24, %s786_s1 }
   0x8   :  { %p554_p2 = pnand %p552_p1, %p549_p0 }
   0xa   :  { %557 = shalt.err (!%p554_p2)
}
   0xb   :  { %s558_s29 = scalar_lea.vmem %s32_s19, 128  ;;  %p563_p4 = scmp.lt.s32.totalorder %s32_s19, %s32_s19 }
   0xc   :  { %p559_p3 = scmp.ne.s32.totalorder %s32_s19, %s558_s29  ;;  %p564_p5 = scmp.lt.s32.totalorder %s558_s29, %s558_s29 }
   0xe   :  { %p565_p6 = por %p564_p5, %p563_p4 }
  0x10   :  { %p566_p7 = pnand %p565_p6, %p559_p3 }
  0x12   :  { %569 = shalt.err (!%p566_p7)
}
  0x13   :  { %s668_s30 = smov 64   ;;  %s669_s6 = smov 4  }
  0x14   :  { %37 = dma.hbm_to_vmem [thread:$0]  %s786_s1, 128, %s32_s19, [#allocation6], %s668_s30, %s668_s30, %s669_s6  }
  0x15   :  { %s570_s11 = scalar_lea.hbm %s785_s0, 128 }
  0x16   :  { %p571_p8 = scmp.ne.s32.totalorder %s785_s0, %s570_s11  ;;  %p574_p9 = scmp.lt.u32.totalorder %s570_s11, %s785_s0 }
  0x18   :  { %p576_p10 = pnand %p574_p9, %p571_p8 }
  0x1a   :  { %579 = shalt.err (!%p576_p10)
}
  0x1b   :  { %s580_s16 = scalar_lea.vmem %s706_s21, 128  ;;  %p585_p12 = scmp.lt.s32.totalorder %s706_s21, %s706_s21 }
  0x1c   :  { %p581_p11 = scmp.ne.s32.totalorder %s706_s21, %s580_s16  ;;  %p586_p13 = scmp.lt.s32.totalorder %s580_s16, %s580_s16 }
  0x1e   :  { %p587_p0 = por %p586_p13, %p585_p12 }
  0x20   :  { %p588_p1 = pnand %p587_p0, %p581_p11 }
  0x22   :  { %591 = shalt.err (!%p588_p1)
}
  0x23   :  { %25 = dma.hbm_to_vmem [thread:$0]  %s785_s0, 128, %s706_s21, [#allocation3], %s668_s30, %s668_s30, %s669_s6  }
  0x24   :  { %s670_s18 = smov [#allocation7]   ;;  %s592_s23 = scalar_lea.hbm %s787_s2, 2048 }
  0x25   :  { %s43_s19 = sshll.u32 %s670_s18, 4  ;;  %p593_p2 = scmp.ne.s32.totalorder %s787_s2, %s592_s23  ;;  %s44_s19 = int_to_ptr.vmem [resolvable:$true] %s43_s19 }
  0x26   :  { %p596_p3 = scmp.lt.u32.totalorder %s592_s23, %s787_s2 }
  0x28   :  { %p598_p4 = pnand %p596_p3, %p593_p2 }
  0x2a   :  { %601 = shalt.err (!%p598_p4)
}
  0x2b   :  { %s602_s28 = scalar_lea.vmem %s44_s19, 2048  ;;  %p607_p6 = scmp.lt.s32.totalorder %s44_s19, %s44_s19 }
  0x2c   :  { %p603_p5 = scmp.ne.s32.totalorder %s44_s19, %s602_s28  ;;  %p608_p7 = scmp.lt.s32.totalorder %s602_s28, %s602_s28 }
  0x2e   :  { %p609_p8 = por %p608_p7, %p607_p6 }
  0x30   :  { %p610_p9 = pnand %p609_p8, %p603_p5 }
  0x32   :  { %613 = shalt.err (!%p610_p9)
}
  0x33   :  { %s671_s0 = smov 128   ;;  %s672_s21 = smov 8  }
  0x34   :  { %49 = dma.hbm_to_vmem [thread:$0]  %s787_s2, 2048, %s44_s19, [#allocation6], %s671_s0, %s671_s0, %s672_s21  }
  0x35   :  { %s673_s8 = smov [#allocation8]   ;;  %s614_s12 = scalar_lea.hbm %s788_s3, 2048 }
  0x36   :  { %s55_s9 = sshll.u32 %s673_s8, 4  ;;  %p615_p10 = scmp.ne.s32.totalorder %s788_s3, %s614_s12  ;;  %s56_s9 = int_to_ptr.vmem [resolvable:$true] %s55_s9 }
  0x37   :  { %p618_p11 = scmp.lt.u32.totalorder %s614_s12, %s788_s3 }
  0x39   :  { %p620_p12 = pnand %p618_p11, %p615_p10 }
  0x3b   :  { %623 = shalt.err (!%p620_p12)
}
  0x3c   :  { %s624_s1 = scalar_lea.vmem %s56_s9, 2048  ;;  %p629_p0 = scmp.lt.s32.totalorder %s56_s9, %s56_s9 }
  0x3d   :  { %p625_p13 = scmp.ne.s32.totalorder %s56_s9, %s624_s1  ;;  %p630_p1 = scmp.lt.s32.totalorder %s624_s1, %s624_s1 }
  0x3f   :  { %p631_p2 = por %p630_p1, %p629_p0 }
  0x41   :  { %p632_p3 = pnand %p631_p2, %p625_p13 }
  0x43   :  { %635 = shalt.err (!%p632_p3)
}
  0x44   :  { %61 = dma.hbm_to_vmem [thread:$0]  %s788_s3, 2048, %s56_s9, [#allocation9], %s671_s0, %s671_s0, %s672_s21  }
  0x45   :  { %658 = dma.done.wait [#allocation3], 128  }
  0x46   :  { %659 = vsyncadd [#allocation3], 4294967168 }
  0x47   :  { %660 = dma.done.wait [#allocation6], 2176  }
  0x48   :  { %661 = vsyncadd [#allocation6], 4294965120 }
  0x49   :  { %662 = dma.done.wait [#allocation9], 2048  }
  0x4a   :  { %663 = vsyncadd [#allocation9], 4294965248  ;;  %v674_v0 = vmov 0   ;;  %v489_v1 = vld [vmem:[#allocation8 + $0x4] ss:$8 sps:$4 sm:$0xff]   ;;  %v77_v33 = vld [vmem:[#allocation2] sm:$0xff]   ;;  %v373_v35 = vlaneseq }
  0x4b   :  { %231 = vmatprep.mubr.bf16.mxu1 %v674_v0  ;;  %360 = vmatprep.mubr.bf16.mxu0 %v674_v0  ;;  %v491_v2 = vld [vmem:[#allocation7 + $0x4] ss:$8 sps:$4 sm:$0xff]   ;;  %v493_v3 = vld [vmem:[#allocation8] ss:$8 sps:$4 sm:$0xff]   ;;  %v495_v5 = vld [vmem:[#allocation8 + $0x14] ss:$8 sps:$4 sm:$0xff]   ;;  %v395_v58 = vunpack.c.l.bf16 %v77_v33  ;;  %v396_v60 = vunpack.c.h.bf16 %v77_v33 }
  0x4c   :  { %199 = vmatprep.subr.bf16.mxu1 %v489_v1  ;;  %v494_v4 = vld [vmem:[#allocation7] ss:$8 sps:$4 sm:$0xff]   ;;  %328 = vmatprep.subr.bf16.mxu0 %v491_v2  ;;  %v497_v6 = vld [vmem:[#allocation7 + $0x14] ss:$8 sps:$4 sm:$0xff]   ;;  %v499_v7 = vld [vmem:[#allocation8 + $0x10] ss:$8 sps:$4 sm:$0xff]  }
  0x4d   :  { %200 = vmatpush1.bf16.msra.mxu1 %v493_v3  ;;  %329 = vmatpush1.bf16.msra.mxu0 %v494_v4  ;;  %v500_v8 = vld [vmem:[#allocation7 + $0x10] ss:$8 sps:$4 sm:$0xff]   ;;  %v501_v9 = vld [vmem:[#allocation8 + $0x24] ss:$8 sps:$4 sm:$0xff]   ;;  %v505_v11 = vld [vmem:[#allocation8 + $0x20] ss:$8 sps:$4 sm:$0xff]  }
  0x4e   :  { %201 = vmatprep.subr.bf16.mxu1 %v495_v5  ;;  %330 = vmatprep.subr.bf16.mxu0 %v497_v6  ;;  %v503_v10 = vld [vmem:[#allocation7 + $0x24] ss:$8 sps:$4 sm:$0xff]   ;;  %v506_v12 = vld [vmem:[#allocation7 + $0x20] ss:$8 sps:$4 sm:$0xff]   ;;  %v507_v13 = vld [vmem:[#allocation8 + $0x34] ss:$8 sps:$4 sm:$0xff]  }
  0x4f   :  { %v509_v14 = vld [vmem:[#allocation7 + $0x34] ss:$8 sps:$4 sm:$0xff]   ;;  %v511_v15 = vld [vmem:[#allocation8 + $0x30] ss:$8 sps:$4 sm:$0xff]   ;;  %v513_v17 = vld [vmem:[#allocation8 + $0x44] ss:$8 sps:$4 sm:$0xff]  }
  0x50   :  { %v512_v16 = vld [vmem:[#allocation7 + $0x30] ss:$8 sps:$4 sm:$0xff]   ;;  %v515_v18 = vld [vmem:[#allocation7 + $0x44] ss:$8 sps:$4 sm:$0xff]   ;;  %v517_v19 = vld [vmem:[#allocation8 + $0x40] ss:$8 sps:$4 sm:$0xff]  }
  0x51   :  { %202 = vmatpush1.bf16.msra.mxu1 %v499_v7  ;;  %331 = vmatpush1.bf16.msra.mxu0 %v500_v8  ;;  %v518_v20 = vld [vmem:[#allocation7 + $0x40] ss:$8 sps:$4 sm:$0xff]   ;;  %v519_v21 = vld [vmem:[#allocation8 + $0x54] ss:$8 sps:$4 sm:$0xff]   ;;  %v523_v23 = vld [vmem:[#allocation8 + $0x50] ss:$8 sps:$4 sm:$0xff]  }
  0x52   :  { %203 = vmatprep.subr.bf16.mxu1 %v501_v9  ;;  %332 = vmatprep.subr.bf16.mxu0 %v503_v10  ;;  %v521_v22 = vld [vmem:[#allocation7 + $0x54] ss:$8 sps:$4 sm:$0xff]   ;;  %v524_v24 = vld [vmem:[#allocation7 + $0x50] ss:$8 sps:$4 sm:$0xff]   ;;  %v525_v25 = vld [vmem:[#allocation8 + $0x64] ss:$8 sps:$4 sm:$0xff]  }
  0x53   :  { %v527_v26 = vld [vmem:[#allocation7 + $0x64] ss:$8 sps:$4 sm:$0xff]   ;;  %v529_v27 = vld [vmem:[#allocation8 + $0x60] ss:$8 sps:$4 sm:$0xff]   ;;  %v531_v29 = vld [vmem:[#allocation8 + $0x74] ss:$8 sps:$4 sm:$0xff]  }
  0x54   :  { %v530_v28 = vld [vmem:[#allocation7 + $0x60] ss:$8 sps:$4 sm:$0xff]   ;;  %v533_v30 = vld [vmem:[#allocation7 + $0x74] ss:$8 sps:$4 sm:$0xff]   ;;  %v535_v31 = vld [vmem:[#allocation8 + $0x70] ss:$8 sps:$4 sm:$0xff]  }
  0x55   :  { %204 = vmatpush1.bf16.msra.mxu1 %v505_v11  ;;  %333 = vmatpush1.bf16.msra.mxu0 %v506_v12  ;;  %v536_v32 = vld [vmem:[#allocation7 + $0x70] ss:$8 sps:$4 sm:$0xff]   ;;  %v374_v36 = vshrl.u32 %v373_v35, 7 }
  0x56   :  { %205 = vmatprep.subr.bf16.mxu1 %v507_v13  ;;  %334 = vmatprep.subr.bf16.mxu0 %v509_v14  ;;  %v537_v34 = vld [vmem:[#allocation5] sm:$0xff]   ;;  %v371_v38 = vld [vmem:[%s789_s4] sm:$0x3]  ;;  %s675_s4 = smov [#allocation10]  }
  0x57   :  { %v375_v37 = vsub.s32 0, %v374_v36  ;;  %v379_v39 = vsub.s32 1, %v374_v36  ;;  %s418_s19 = sshll.u32 %s675_s4, 4  ;;  %s419_s19 = int_to_ptr.vmem [resolvable:$true] %s418_s19 }
  0x58   :  { %s636_s20 = scalar_lea.vmem %s419_s19, 128  ;;  %p641_p5 = scmp.lt.s32.totalorder %s419_s19, %s419_s19 }
  0x59   :  { %206 = vmatpush1.bf16.msra.mxu1 %v511_v15  ;;  %335 = vmatpush1.bf16.msra.mxu0 %v512_v16  ;;  %v376_v40 = vrot.slane %v371_v38, %v375_v37  ;;  %v380_v43 = vrot.slane %v371_v38, %v379_v39  ;;  %p637_p4 = scmp.ne.s32.totalorder %s419_s19, %s636_s20  ;;  %p642_p6 = scmp.lt.s32.totalorder %s636_s20, %s636_s20 }
  0x5a   :  { %207 = vmatprep.subr.bf16.mxu1 %v513_v17  ;;  %336 = vmatprep.subr.bf16.mxu0 %v515_v18 }
  0x5b   :  { %p643_p7 = por %p642_p6, %p641_p5 }
  0x5d   :  { %208 = vmatpush1.bf16.msra.mxu1 %v517_v19  ;;  %337 = vmatpush1.bf16.msra.mxu0 %v518_v20  ;;  %p644_p8 = pnand %p643_p7, %p637_p4 }
  0x5e   :  { %209 = vmatprep.subr.bf16.mxu1 %v519_v21  ;;  %338 = vmatprep.subr.bf16.mxu0 %v521_v22 }
  0x61   :  { %210 = vmatpush1.bf16.msra.mxu1 %v523_v23  ;;  %339 = vmatpush1.bf16.msra.mxu0 %v524_v24 }
  0x62   :  { %211 = vmatprep.subr.bf16.mxu1 %v525_v25  ;;  %340 = vmatprep.subr.bf16.mxu0 %v527_v26 }
  0x65   :  { %212 = vmatpush1.bf16.msra.mxu1 %v529_v27  ;;  %341 = vmatpush1.bf16.msra.mxu0 %v530_v28 }
  0x66   :  { %213 = vmatprep.subr.bf16.mxu1 %v531_v29  ;;  %342 = vmatprep.subr.bf16.mxu0 %v533_v30 }
  0x69   :  { %214 = vmatpush1.bf16.msra.mxu1 %v535_v31  ;;  %343 = vmatpush1.bf16.msra.mxu0 %v536_v32 }
  0x6c   :  { %232 = vmatmul.mubr.bf16.vlgmr.msra.gmra.mrb[0].mxu1 %v537_v34  ;;  %361 = vmatmul.mubr.bf16.vlgmr.msra.gmra.mrb[0].mxu0 %v77_v33 }
 0x13f   :  { %v233_v41 = vpop.f32.mrb[0].mxu1  ;;  %v362_v42 = vpop.f32.mrb[0].mxu0 }
 0x140   :  { %v363_v44 = vadd.f32 %v362_v42, %v233_v41  ;;  %v235_v45 = vpop.f32.mrb[1].mxu1  ;;  %v364_v46 = vpop.f32.mrb[1].mxu0 }
 0x141   :  { %v365_v47 = vadd.f32 %v364_v46, %v235_v45  ;;  %v237_v48 = vpop.f32.mrb[2].mxu1  ;;  %v366_v49 = vpop.f32.mrb[2].mxu0 }
 0x142   :  { %v383_v50 = vadd.f32 %v376_v40, %v363_v44  ;;  %v367_v51 = vadd.f32 %v366_v49, %v237_v48  ;;  %v239_v52 = vpop.f32.mrb[3].mxu1  ;;  %v368_v53 = vpop.f32.mrb[3].mxu0 }
 0x143   :  { %v384_v54 = vadd.f32 %v380_v43, %v365_v47  ;;  %v369_v55 = vadd.f32 %v368_v53, %v239_v52 }
 0x144   :  { %540 = vtanh.f32 %v383_v50  ;;  %v385_v56 = vadd.f32 %v376_v40, %v367_v51 }
 0x145   :  { %542 = vtanh.f32 %v384_v54  ;;  %v386_v57 = vadd.f32 %v380_v43, %v369_v55 }
 0x146   :  { %544 = vtanh.f32 %v385_v56 }
 0x147   :  { %546 = vtanh.f32 %v386_v57 }
 0x14e   :  { %v541_v59 = vpop.eup %540 }
 0x14f   :  { %v543_v61 = vpop.eup %542  ;;  %v391_v62 = vadd.f32 1.0, %v541_v59 }
 0x150   :  { %v545_v63 = vpop.eup %544  ;;  %v397_v0 = vsub.f32 %v543_v61, %v395_v58 }
 0x151   :  { %v547_v1 = vpop.eup %546  ;;  %v393_v2 = vmul.f32 0.5, %v391_v62  ;;  %v392_v3 = vadd.f32 1.0, %v545_v63 }
 0x152   :  { %v398_v4 = vsub.f32 %v547_v1, %v396_v60 }
 0x153   :  { %v394_v5 = vmul.f32 0.5, %v392_v3  ;;  %v399_v6 = vmul.f32 %v397_v0, %v393_v2 }
 0x155   :  { %v400_v7 = vmul.f32 %v398_v4, %v394_v5  ;;  %v401_v8 = vadd.f32 %v399_v6, %v395_v58 }
 0x157   :  { %v402_v9 = vadd.f32 %v400_v7, %v396_v60 }
 0x159   :  { %v473_v10 = vpack.c.bf16 %v402_v9, %v401_v8 }
 0x15b   :  { %474 = vst [vmem:[#allocation10] sm:$0xff] %v473_v10  }
 0x15c   :  { %647 = shalt.err (!%p644_p8)
}
 0x15d   :  { %s648_s24 = scalar_lea.hbm %s790_s5, 128 }
 0x15e   :  { %p649_p9 = scmp.ne.s32.totalorder %s790_s5, %s648_s24  ;;  %p652_p10 = scmp.lt.u32.totalorder %s648_s24, %s790_s5 }
 0x160   :  { %p654_p11 = pnand %p652_p10, %p649_p9 }
 0x162   :  { %657 = shalt.err (!%p654_p11)
}
 0x163   :  { %424 = dma.vmem_to_hbm [thread:$0]  %s419_s19, 128, %s790_s5, [#allocation4], %s668_s30, %s668_s30, %s669_s6  }
 0x164   :  { %664 = dma.done.wait [#allocation4], 128  }
 0x165   :  { %665 = vsyncadd [#allocation4], 4294967168 }
 0x166   :  { %428 = vsyncpa [#allocation3], 1 }
 0x167   :  { %429 = vsyncpa [#allocation6], 1 }
 0x168   :  { %430 = vsyncpa [#allocation9], 1 }
 0x169   :  { %431 = vsyncpa [#allocation4], 1 }

// kernel: tpu_custom_call.1
= control target key start
LH: loop header
LB: loop body
LE: loop exit
PB: predicated region body
PF: predicated region fallthrough
CT: control target
= control target key end

     0   :  { %10 = vsyncpa [#allocation3], 0  ;;  %s785_s0 = inlined_call_operand.hbm [shape: bf16[16,128], index: 0, kind: input, shape index: {}]   ;;  %s786_s1 = inlined_call_operand.hbm [shape: bf16[16,128], index: 1, kind: input, shape index: {}]   ;;  %s787_s2 = inlined_call_operand.hbm [shape: bf16[128,256], index: 2, kind: input, shape index: {}]   ;;  %s788_s3 = inlined_call_operand.hbm [shape: bf16[128,256], index: 3, kind: input, shape index: {}]   ;;  %s789_s4 = inlined_call_operand.vmem [shape: f32[1,256], index: 4, kind: input, shape index: {}]   ;;  %s790_s5 = inlined_call_operand.hbm [shape: bf16[16,128], index: 5, kind: output, shape index: {}]  }
   0x1   :  { %11 = vsyncpa [#allocation6], 0 }
   0x2   :  { %12 = vsyncpa [#allocation9], 0 }
   0x3   :  { %13 = vsyncpa [#allocation4], 0  ;;  %s666_s18 = smov [#allocation5]   ;;  %s667_s20 = smov [#allocation2]  }
   0x4   :  { %s31_s19 = sshll.u32 %s666_s18, 4  ;;  %s19_s21 = sshll.u32 %s667_s20, 4  ;;  %s32_s19 = int_to_ptr.vmem [resolvable:$true] %s31_s19  ;;  %s706_s21 = int_to_ptr.vmem [resolvable:$true] %s19_s21 }
   0x5   :  { %s548_s24 = scalar_lea.hbm %s786_s1, 128 }
   0x6   :  { %p549_p0 = scmp.ne.s32.totalorder %s786_s1, %s548_s24  ;;  %p552_p1 = scmp.lt.u32.totalorder %s548_s24, %s786_s1 }
   0x8   :  { %p554_p2 = pnand %p552_p1, %p549_p0 }
   0xa   :  { %557 = shalt.err (!%p554_p2)
}
   0xb   :  { %s558_s29 = scalar_lea.vmem %s32_s19, 128  ;;  %p563_p4 = scmp.lt.s32.totalorder %s32_s19, %s32_s19 }
   0xc   :  { %p559_p3 = scmp.ne.s32.totalorder %s32_s19, %s558_s29  ;;  %p564_p5 = scmp.lt.s32.totalorder %s558_s29, %s558_s29 }
   0xe   :  { %p565_p6 = por %p564_p5, %p563_p4 }
  0x10   :  { %p566_p7 = pnand %p565_p6, %p559_p3 }
  0x12   :  { %569 = shalt.err (!%p566_p7)
}
  0x13   :  { %s668_s30 = smov 64   ;;  %s669_s6 = smov 4  }
  0x14   :  { %37 = dma.hbm_to_vmem [thread:$0]  %s786_s1, 128, %s32_s19, [#allocation6], %s668_s30, %s668_s30, %s669_s6  }
  0x15   :  { %s570_s11 = scalar_lea.hbm %s785_s0, 128 }
  0x16   :  { %p571_p8 = scmp.ne.s32.totalorder %s785_s0, %s570_s11  ;;  %p574_p9 = scmp.lt.u32.totalorder %s570_s11, %s785_s0 }
  0x18   :  { %p576_p10 = pnand %p574_p9, %p571_p8 }
  0x1a   :  { %579 = shalt.err (!%p576_p10)
}
  0x1b   :  { %s580_s16 = scalar_lea.vmem %s706_s21, 128  ;;  %p585_p12 = scmp.lt.s32.totalorder %s706_s21, %s706_s21 }
  0x1c   :  { %p581_p11 = scmp.ne.s32.totalorder %s706_s21, %s580_s16  ;;  %p586_p13 = scmp.lt.s32.totalorder %s580_s16, %s580_s16 }
  0x1e   :  { %p587_p0 = por %p586_p13, %p585_p12 }
  0x20   :  { %p588_p1 = pnand %p587_p0, %p581_p11 }
  0x22   :  { %591 = shalt.err (!%p588_p1)
}
  0x23   :  { %25 = dma.hbm_to_vmem [thread:$0]  %s785_s0, 128, %s706_s21, [#allocation3], %s668_s30, %s668_s30, %s669_s6  }
  0x24   :  { %s670_s18 = smov [#allocation7]   ;;  %s592_s23 = scalar_lea.hbm %s787_s2, 2048 }
  0x25   :  { %s43_s19 = sshll.u32 %s670_s18, 4  ;;  %p593_p2 = scmp.ne.s32.totalorder %s787_s2, %s592_s23  ;;  %s44_s19 = int_to_ptr.vmem [resolvable:$true] %s43_s19 }
  0x26   :  { %p596_p3 = scmp.lt.u32.totalorder %s592_s23, %s787_s2 }
  0x28   :  { %p598_p4 = pnand %p596_p3, %p593_p2 }
  0x2a   :  { %601 = shalt.err (!%p598_p4)
}
  0x2b   :  { %s602_s28 = scalar_lea.vmem %s44_s19, 2048  ;;  %p607_p6 = scmp.lt.s32.totalorder %s44_s19, %s44_s19 }
  0x2c   :  { %p603_p5 = scmp.ne.s32.totalorder %s44_s19, %s602_s28  ;;  %p608_p7 = scmp.lt.s32.totalorder %s602_s28, %s602_s28 }
  0x2e   :  { %p609_p8 = por %p608_p7, %p607_p6 }
  0x30   :  { %p610_p9 = pnand %p609_p8, %p603_p5 }
  0x32   :  { %613 = shalt.err (!%p610_p9)
}
  0x33   :  { %s671_s0 = smov 128   ;;  %s672_s21 = smov 8  }
  0x34   :  { %49 = dma.hbm_to_vmem [thread:$0]  %s787_s2, 2048, %s44_s19, [#allocation6], %s671_s0, %s671_s0, %s672_s21  }
  0x35   :  { %s673_s8 = smov [#allocation8]   ;;  %s614_s12 = scalar_lea.hbm %s788_s3, 2048 }
  0x36   :  { %s55_s9 = sshll.u32 %s673_s8, 4  ;;  %p615_p10 = scmp.ne.s32.totalorder %s788_s3, %s614_s12  ;;  %s56_s9 = int_to_ptr.vmem [resolvable:$true] %s55_s9 }
  0x37   :  { %p618_p11 = scmp.lt.u32.totalorder %s614_s12, %s788_s3 }
  0x39   :  { %p620_p12 = pnand %p618_p11, %p615_p10 }
  0x3b   :  { %623 = shalt.err (!%p620_p12)
}
  0x3c   :  { %s624_s1 = scalar_lea.vmem %s56_s9, 2048  ;;  %p629_p0 = scmp.lt.s32.totalorder %s56_s9, %s56_s9 }
  0x3d   :  { %p625_p13 = scmp.ne.s32.totalorder %s56_s9, %s624_s1  ;;  %p630_p1 = scmp.lt.s32.totalorder %s624_s1, %s624_s1 }
  0x3f   :  { %p631_p2 = por %p630_p1, %p629_p0 }
  0x41   :  { %p632_p3 = pnand %p631_p2, %p625_p13 }
  0x43   :  { %635 = shalt.err (!%p632_p3)
}
  0x44   :  { %61 = dma.hbm_to_vmem [thread:$0]  %s788_s3, 2048, %s56_s9, [#allocation9], %s671_s0, %s671_s0, %s672_s21  }
  0x45   :  { %658 = dma.done.wait [#allocation3], 128  }
  0x46   :  { %659 = vsyncadd [#allocation3], 4294967168 }
  0x47   :  { %660 = dma.done.wait [#allocation6], 2176  }
  0x48   :  { %661 = vsyncadd [#allocation6], 4294965120 }
  0x49   :  { %662 = dma.done.wait [#allocation9], 2048  }
  0x4a   :  { %663 = vsyncadd [#allocation9], 4294965248  ;;  %v674_v0 = vmov 0   ;;  %v489_v1 = vld [vmem:[#allocation8 + $0x4] ss:$8 sps:$4 sm:$0xff]   ;;  %v77_v33 = vld [vmem:[#allocation2] sm:$0xff]   ;;  %v373_v35 = vlaneseq }
  0x4b   :  { %231 = vmatprep.mubr.bf16.mxu1 %v674_v0  ;;  %360 = vmatprep.mubr.bf16.mxu0 %v674_v0  ;;  %v491_v2 = vld [vmem:[#allocation7 + $0x4] ss:$8 sps:$4 sm:$0xff]   ;;  %v493_v3 = vld [vmem:[#allocation8] ss:$8 sps:$4 sm:$0xff]   ;;  %v495_v5 = vld [vmem:[#allocation8 + $0x14] ss:$8 sps:$4 sm:$0xff]   ;;  %v395_v58 = vunpack.c.l.bf16 %v77_v33  ;;  %v396_v60 = vunpack.c.h.bf16 %v77_v33 }
  0x4c   :  { %199 = vmatprep.subr.bf16.mxu1 %v489_v1  ;;  %v494_v4 = vld [vmem:[#allocation7] ss:$8 sps:$4 sm:$0xff]   ;;  %328 = vmatprep.subr.bf16.mxu0 %v491_v2  ;;  %v497_v6 = vld [vmem:[#allocation7 + $0x14] ss:$8 sps:$4 sm:$0xff]   ;;  %v499_v7 = vld [vmem:[#allocation8 + $0x10] ss:$8 sps:$4 sm:$0xff]  }
  0x4d   :  { %200 = vmatpush1.bf16.msra.mxu1 %v493_v3  ;;  %329 = vmatpush1.bf16.msra.mxu0 %v494_v4  ;;  %v500_v8 = vld [vmem:[#allocation7 + $0x10] ss:$8 sps:$4 sm:$0xff]   ;;  %v501_v9 = vld [vmem:[#allocation8 + $0x24] ss:$8 sps:$4 sm:$0xff]   ;;  %v505_v11 = vld [vmem:[#allocation8 + $0x20] ss:$8 sps:$4 sm:$0xff]  }
  0x4e   :  { %201 = vmatprep.subr.bf16.mxu1 %v495_v5  ;;  %330 = vmatprep.subr.bf16.mxu0 %v497_v6  ;;  %v503_v10 = vld [vmem:[#allocation7 + $0x24] ss:$8 sps:$4 sm:$0xff]   ;;  %v506_v12 = vld [vmem:[#allocation7 + $0x20] ss:$8 sps:$4 sm:$0xff]   ;;  %v507_v13 = vld [vmem:[#allocation8 + $0x34] ss:$8 sps:$4 sm:$0xff]  }
  0x4f   :  { %v509_v14 = vld [vmem:[#allocation7 + $0x34] ss:$8 sps:$4 sm:$0xff]   ;;  %v511_v15 = vld [vmem:[#allocation8 + $0x30] ss:$8 sps:$4 sm:$0xff]   ;;  %v513_v17 = vld [vmem:[#allocation8 + $0x44] ss:$8 sps:$4 sm:$0xff]  }
  0x50   :  { %v512_v16 = vld [vmem:[#allocation7 + $0x30] ss:$8 sps:$4 sm:$0xff]   ;;  %v515_v18 = vld [vmem:[#allocation7 + $0x44] ss:$8 sps:$4 sm:$0xff]   ;;  %v517_v19 = vld [vmem:[#allocation8 + $0x40] ss:$8 sps:$4 sm:$0xff]  }
  0x51   :  { %202 = vmatpush1.bf16.msra.mxu1 %v499_v7  ;;  %331 = vmatpush1.bf16.msra.mxu0 %v500_v8  ;;  %v518_v20 = vld [vmem:[#allocation7 + $0x40] ss:$8 sps:$4 sm:$0xff]   ;;  %v519_v21 = vld [vmem:[#allocation8 + $0x54] ss:$8 sps:$4 sm:$0xff]   ;;  %v523_v23 = vld [vmem:[#allocation8 + $0x50] ss:$8 sps:$4 sm:$0xff]  }
  0x52   :  { %203 = vmatprep.subr.bf16.mxu1 %v501_v9  ;;  %332 = vmatprep.subr.bf16.mxu0 %v503_v10  ;;  %v521_v22 = vld [vmem:[#allocation7 + $0x54] ss:$8 sps:$4 sm:$0xff]   ;;  %v524_v24 = vld [vmem:[#allocation7 + $0x50] ss:$8 sps:$4 sm:$0xff]   ;;  %v525_v25 = vld [vmem:[#allocation8 + $0x64] ss:$8 sps:$4 sm:$0xff]  }
  0x53   :  { %v527_v26 = vld [vmem:[#allocation7 + $0x64] ss:$8 sps:$4 sm:$0xff]   ;;  %v529_v27 = vld [vmem:[#allocation8 + $0x60] ss:$8 sps:$4 sm:$0xff]   ;;  %v531_v29 = vld [vmem:[#allocation8 + $0x74] ss:$8 sps:$4 sm:$0xff]  }
  0x54   :  { %v530_v28 = vld [vmem:[#allocation7 + $0x60] ss:$8 sps:$4 sm:$0xff]   ;;  %v533_v30 = vld [vmem:[#allocation7 + $0x74] ss:$8 sps:$4 sm:$0xff]   ;;  %v535_v31 = vld [vmem:[#allocation8 + $0x70] ss:$8 sps:$4 sm:$0xff]  }
  0x55   :  { %204 = vmatpush1.bf16.msra.mxu1 %v505_v11  ;;  %333 = vmatpush1.bf16.msra.mxu0 %v506_v12  ;;  %v536_v32 = vld [vmem:[#allocation7 + $0x70] ss:$8 sps:$4 sm:$0xff]   ;;  %v374_v36 = vshrl.u32 %v373_v35, 7 }
  0x56   :  { %205 = vmatprep.subr.bf16.mxu1 %v507_v13  ;;  %334 = vmatprep.subr.bf16.mxu0 %v509_v14  ;;  %v537_v34 = vld [vmem:[#allocation5] sm:$0xff]   ;;  %v371_v38 = vld [vmem:[%s789_s4] sm:$0x3]  ;;  %s675_s4 = smov [#allocation10]  }
  0x57   :  { %v375_v37 = vsub.s32 0, %v374_v36  ;;  %v379_v39 = vsub.s32 1, %v374_v36  ;;  %s418_s19 = sshll.u32 %s675_s4, 4  ;;  %s419_s19 = int_to_ptr.vmem [resolvable:$true] %s418_s19 }
  0x58   :  { %s636_s20 = scalar_lea.vmem %s419_s19, 128  ;;  %p641_p5 = scmp.lt.s32.totalorder %s419_s19, %s419_s19 }
  0x59   :  { %206 = vmatpush1.bf16.msra.mxu1 %v511_v15  ;;  %335 = vmatpush1.bf16.msra.mxu0 %v512_v16  ;;  %v376_v40 = vrot.slane %v371_v38, %v375_v37  ;;  %v380_v43 = vrot.slane %v371_v38, %v379_v39  ;;  %p637_p4 = scmp.ne.s32.totalorder %s419_s19, %s636_s20  ;;  %p642_p6 = scmp.lt.s32.totalorder %s636_s20, %s636_s20 }
  0x5a   :  { %207 = vmatprep.subr.bf16.mxu1 %v513_v17  ;;  %336 = vmatprep.subr.bf16.mxu0 %v515_v18 }
  0x5b   :  { %p643_p7 = por %p642_p6, %p641_p5 }
  0x5d   :  { %208 = vmatpush1.bf16.msra.mxu1 %v517_v19  ;;  %337 = vmatpush1.bf16.msra.mxu0 %v518_v20  ;;  %p644_p8 = pnand %p643_p7, %p637_p4 }
  0x5e   :  { %209 = vmatprep.subr.bf16.mxu1 %v519_v21  ;;  %338 = vmatprep.subr.bf16.mxu0 %v521_v22 }
  0x61   :  { %210 = vmatpush1.bf16.msra.mxu1 %v523_v23  ;;  %339 = vmatpush1.bf16.msra.mxu0 %v524_v24 }
  0x62   :  { %211 = vmatprep.subr.bf16.mxu1 %v525_v25  ;;  %340 = vmatprep.subr.bf16.mxu0 %v527_v26 }
  0x65   :  { %212 = vmatpush1.bf16.msra.mxu1 %v529_v27  ;;  %341 = vmatpush1.bf16.msra.mxu0 %v530_v28 }
  0x66   :  { %213 = vmatprep.subr.bf16.mxu1 %v531_v29  ;;  %342 = vmatprep.subr.bf16.mxu0 %v533_v30 }
  0x69   :  { %214 = vmatpush1.bf16.msra.mxu1 %v535_v31  ;;  %343 = vmatpush1.bf16.msra.mxu0 %v536_v32 }
  0x6c   :  { %232 = vmatmul.mubr.bf16.vlgmr.msra.gmra.mrb[0].mxu1 %v537_v34  ;;  %361 = vmatmul.mubr.bf16.vlgmr.msra.gmra.mrb[0].mxu0 %v77_v33 }
 0x13f   :  { %v233_v41 = vpop.f32.mrb[0].mxu1  ;;  %v362_v42 = vpop.f32.mrb[0].mxu0 }
 0x140   :  { %v363_v44 = vadd.f32 %v362_v42, %v233_v41  ;;  %v235_v45 = vpop.f32.mrb[1].mxu1  ;;  %v364_v46 = vpop.f32.mrb[1].mxu0 }
 0x141   :  { %v365_v47 = vadd.f32 %v364_v46, %v235_v45  ;;  %v237_v48 = vpop.f32.mrb[2].mxu1  ;;  %v366_v49 = vpop.f32.mrb[2].mxu0 }
 0x142   :  { %v383_v50 = vadd.f32 %v376_v40, %v363_v44  ;;  %v367_v51 = vadd.f32 %v366_v49, %v237_v48  ;;  %v239_v52 = vpop.f32.mrb[3].mxu1  ;;  %v368_v53 = vpop.f32.mrb[3].mxu0 }
 0x143   :  { %v384_v54 = vadd.f32 %v380_v43, %v365_v47  ;;  %v369_v55 = vadd.f32 %v368_v53, %v239_v52 }
 0x144   :  { %540 = vtanh.f32 %v383_v50  ;;  %v385_v56 = vadd.f32 %v376_v40, %v367_v51 }
 0x145   :  { %542 = vtanh.f32 %v384_v54  ;;  %v386_v57 = vadd.f32 %v380_v43, %v369_v55 }
 0x146   :  { %544 = vtanh.f32 %v385_v56 }
 0x147   :  { %546 = vtanh.f32 %v386_v57 }
 0x14e   :  { %v541_v59 = vpop.eup %540 }
 0x14f   :  { %v543_v61 = vpop.eup %542  ;;  %v391_v62 = vadd.f32 1.0, %v541_v59 }
 0x150   :  { %v545_v63 = vpop.eup %544  ;;  %v397_v0 = vsub.f32 %v543_v61, %v395_v58 }
 0x151   :  { %v547_v1 = vpop.eup %546  ;;  %v393_v2 = vmul.f32 0.5, %v391_v62  ;;  %v392_v3 = vadd.f32 1.0, %v545_v63 }
 0x152   :  { %v398_v4 = vsub.f32 %v547_v1, %v396_v60 }
 0x153   :  { %v394_v5 = vmul.f32 0.5, %v392_v3  ;;  %v399_v6 = vmul.f32 %v397_v0, %v393_v2 }
 0x155   :  { %v400_v7 = vmul.f32 %v398_v4, %v394_v5  ;;  %v401_v8 = vadd.f32 %v399_v6, %v395_v58 }
 0x157   :  { %v402_v9 = vadd.f32 %v400_v7, %v396_v60 }
 0x159   :  { %v473_v10 = vpack.c.bf16 %v402_v9, %v401_v8 }
 0x15b   :  { %474 = vst [vmem:[#allocation10] sm:$0xff] %v473_v10  }
 0x15c   :  { %647 = shalt.err (!%p644_p8)
}
 0x15d   :  { %s648_s24 = scalar_lea.hbm %s790_s5, 128 }
 0x15e   :  { %p649_p9 = scmp.ne.s32.totalorder %s790_s5, %s648_s24  ;;  %p652_p10 = scmp.lt.u32.totalorder %s648_s24, %s790_s5 }
 0x160   :  { %p654_p11 = pnand %p652_p10, %p649_p9 }
 0x162   :  { %657 = shalt.err (!%p654_p11)
}
 0x163   :  { %424 = dma.vmem_to_hbm [thread:$0]  %s419_s19, 128, %s790_s5, [#allocation4], %s668_s30, %s668_s30, %s669_s6  }
 0x164   :  { %664 = dma.done.wait [#allocation4], 128  }
 0x165   :  { %665 = vsyncadd [#allocation4], 4294967168 }
 0x166   :  { %428 = vsyncpa [#allocation3], 1 }
 0x167   :  { %429 = vsyncpa [#allocation6], 1 }
 0x168   :  { %430 = vsyncpa [#allocation9], 1 }
 0x169   :  { %431 = vsyncpa [#allocation4], 1 }

</bundles_post_ra>
